<compile_context>
chip_gen: v7x
topology: tpu7x:2x2x1
jax: 0.10.0
libtpu: 0.0.40
codegen_flags: <defaults>
</compile_context>

<pallas_src>
import math
import functools

import jax
import jax.numpy as jnp
from jax import lax
from jax.experimental import pallas as pl
from jax.experimental.pallas import tpu as pltpu


_MASK_DTYPE = jnp.bfloat16  # narrow storage for the (B, N, lanes) mask operand


def _conv_pos_embed_kernel(*refs, N, K, pad, front, with_mask, tile_reps,
                           compute_dtype, approx_gelu):
    """One (batch, channel-tile) block per grid step.

    refs (with_mask=True):  x_ref (1,N,TC), m_ref (1,N,ML), w_ref (K,TC), b_ref (1,TC),
                            o_ref (1,N,TC), xpad (front+N+pad, TC) VMEM scratch.
    refs (with_mask=False): same without m_ref.
    """
    if with_mask:
        x_ref, m_ref, w_ref, b_ref, o_ref, xpad = refs
    else:
        x_ref, w_ref, b_ref, o_ref, xpad = refs

    TC = x_ref.shape[-1]
    cdt = compute_dtype

    # Lane-dense keep-mask for this tile.  The operand is only ML (<=128) lanes wide; it is
    # replicated across the channel tile in-register (cheap vreg copies, no extra DMA).
    if with_mask:
        m = m_ref[0]
        if tile_reps > 1:
            m = jnp.tile(m, (1, tile_reps))
        keep = m != jnp.zeros((), m.dtype)

    # Stage the input tile into the zero-haloed scratch.  masked_fill(~mask, 0) is applied
    # here, in-kernel, on data already in VMEM (review item #1; NaN-safe select).
    xv = x_ref[0].astype(cdt)
    if with_mask:
        xv = jnp.where(keep, xv, jnp.zeros((), cdt))
    if pad > 0:
        # Only the halo rows the taps actually read need to be zeroed.
        xpad[pl.ds(front - pad, pad), :] = jnp.zeros((pad, TC), cdt)
        xpad[pl.ds(front + N, pad), :] = jnp.zeros((pad, TC), cdt)
    xpad[pl.ds(front, N), :] = xv

    # Depthwise conv: out[n, c] = sum_t x[n + t - pad, c] * w[t, c] + b[c].
    # Bias folded into the first-tap accumulator (saves two full (N,TC) VALU passes);
    # per-tap weight read as a (1, TC) row -> single stride-0 sublane-broadcast load.
    acc = xpad[pl.ds(front - pad, N), :] * w_ref[pl.ds(0, 1), :] + b_ref[...]
    for t in range(1, K):  # small static unrolled tap loop (plain vld at static offsets)
        acc = acc + xpad[pl.ds(front - pad + t, N), :] * w_ref[pl.ds(t, 1), :]

    if approx_gelu:
        # tanh-approximate GELU (EUP slot on v6e/v7x; not bit-identical to torch GELU()).
        a = acc
        y = 0.5 * a * (1.0 + jnp.tanh(0.7978845608028654 * (a + 0.044715 * a * a * a)))
    else:
        # Exact erf-based GELU (matches torch.nn.GELU() default), evaluated in f32.
        a = acc.astype(jnp.float32)
        y = 0.5 * a * (1.0 + lax.erf(a * 0.7071067811865476))

    if with_mask:
        y = jnp.where(keep, y, jnp.zeros((), y.dtype))

    o_ref[0] = y.astype(o_ref.dtype)


def _bf16_vector_compute_ok():
    """True on TPU generations with bf16 VALU/EUP (v6e / v7x); False on v5e and older."""
    try:
        kind = jax.devices()[0].device_kind.lower()
    except Exception:
        return False
    return any(tag in kind for tag in ("v6", "v7", "tpu6", "tpu7", "trillium", "ironwood"))


def _device_vmem_bytes():
    """Physical VMEM per TensorCore; conservative fallback if the query is unavailable."""
    try:
        return int(pltpu.get_tpu_info().vmem_capacity_bytes)
    except Exception:
        return 64 * 2 ** 20  # v7x per-core VMEM; safe lower bound for v5e/v6e too


def _mask_lane_width(tc):
    return 128 if (tc > 128 and tc % 128 == 0) else tc


def _footprint_bytes(N, tc, K, pad, front, x_sz, o_sz, c_sz, with_mask):
    blk = N * tc
    total = 2 * blk * x_sz + 2 * blk * o_sz                      # double-buffered x / out
    if with_mask:
        total += 2 * N * _mask_lane_width(tc) * jnp.dtype(_MASK_DTYPE).itemsize
    total += (front + N + pad) * tc * c_sz                       # haloed scratch
    total += 4 * blk * 4                                         # acc / gelu / select temps
    total += (K + 2) * tc * 4                                    # weights, bias, misc
    return total


def _pick_channel_tile(C, max_tile, fits):
    """Largest tile <= max_tile that divides C (a multiple of 128 when actually tiling)
    and fits the VMEM budget; falls back to the smallest legal candidate."""
    cands = []
    if C <= max_tile:
        cands.append(C)
    t = (min(max_tile, C) // 128) * 128
    while t >= 128:
        if C % t == 0 and t != C:
            cands.append(t)
        t -= 128
    if not cands:
        cands.append(C)  # C > max_tile but no 128-multiple divisor: full channel dim
    for tc in cands:
        if fits(tc):
            return tc
    return cands[-1]


def conv_position_embed(x, weight, bias, mask=None, *, max_channel_tile=256,
                        compute_dtype=None, approximate_gelu=False):
    """x: (B, N, C); weight: (C, 1, K) depthwise conv weight (torch layout); bias: (C,);
    mask: (B, N) bool or None.  Returns (B, N, C) in x.dtype."""
    B, N, C = x.shape
    K = weight.shape[-1]
    assert K % 2 == 1, "kernel_size must be odd"
    pad = K // 2
    with_mask = mask is not None

    # Compute dtype: bf16 only when the input is bf16 AND the chip has a bf16 vector unit
    # (v6e / v7x); otherwise f32 (v5e has no bf16 VALU/EUP, and f32 inputs keep f32 math).
    if compute_dtype is None:
        if x.dtype == jnp.bfloat16 and _bf16_vector_compute_ok():
            compute_dtype = jnp.bfloat16
        else:
            compute_dtype = jnp.float32
    compute_dtype = jnp.dtype(compute_dtype)
    c_sz = compute_dtype.itemsize
    sub_align = 8 * (4 // c_sz)                 # rows per 32-bit sublane group (8 f32 / 16 bf16)
    front = (-(-pad // sub_align)) * sub_align if pad > 0 else 0

    # Channel tile chosen so the per-step VMEM footprint fits the device budget.
    cap = _device_vmem_bytes()
    budget = int(0.75 * cap)
    x_sz = jnp.dtype(x.dtype).itemsize

    def fits(tc):
        return _footprint_bytes(N, tc, K, pad, front, x_sz, x_sz, c_sz, with_mask) <= budget

    TC = _pick_channel_tile(C, max_channel_tile, fits)
    n_ct = C // TC
    ML = _mask_lane_width(TC)
    tile_reps = TC // ML

    # (C, 1, K) -> (K, C): each tap is a lane-aligned row of per-channel weights.
    w_kc = jnp.transpose(weight[:, 0, :], (1, 0)).astype(compute_dtype)   # (K, C)
    b_1c = bias.reshape(1, C).astype(compute_dtype)                       # (1, C)

    kernel = functools.partial(
        _conv_pos_embed_kernel, N=N, K=K, pad=pad, front=front, with_mask=with_mask,
        tile_reps=tile_reps, compute_dtype=compute_dtype, approx_gelu=approximate_gelu)

    in_specs = [pl.BlockSpec((1, N, TC), lambda i, j: (i, 0, j))]
    inputs = [x]
    if with_mask:
        # Narrow (bf16, <=128-lane) mask operand; its block index is constant in j, so it
        # is DMA'd once per batch element and replicated across the tile in-register.
        m_tile = jnp.broadcast_to(mask[..., None], (B, N, ML)).astype(_MASK_DTYPE)
        in_specs.append(pl.BlockSpec((1, N, ML), lambda i, j: (i, 0, 0)))
        inputs.append(m_tile)
    in_specs += [
        pl.BlockSpec((K, TC), lambda i, j: (0, j)),
        pl.BlockSpec((1, TC), lambda i, j: (0, j)),
    ]
    inputs += [w_kc, b_1c]

    est = _footprint_bytes(N, TC, K, pad, front, x_sz, x_sz, c_sz, with_mask)
    # Clamp the scoped VMEM request below the physical per-core capacity (v7x: 64 MiB).
    vmem_limit = int(min(int(0.85 * cap), max(32 * 2 ** 20, 2 * est)))

    return pl.pallas_call(
        kernel,
        out_shape=jax.ShapeDtypeStruct((B, N, C), x.dtype),
        grid_spec=pltpu.PrefetchScalarGridSpec(
            num_scalar_prefetch=0,
            grid=(B, n_ct),
            in_specs=in_specs,
            out_specs=pl.BlockSpec((1, N, TC), lambda i, j: (i, 0, j)),
            scratch_shapes=[pltpu.VMEM((front + N + pad, TC), compute_dtype)],
        ),
        compiler_params=pltpu.CompilerParams(
            dimension_semantics=("parallel", "parallel"),
            vmem_limit_bytes=vmem_limit,
        ),
    )(*inputs)


def _reference(x, weight, bias, mask=None):
    """Pure-JAX f32 reference mirroring the PyTorch module."""
    x = x.astype(jnp.float32)
    w_kc = jnp.transpose(weight[:, 0, :], (1, 0)).astype(jnp.float32)  # (K, C)
    b = bias.astype(jnp.float32)
    if mask is not None:
        x = jnp.where(mask[..., None], x, 0.0)
    K = w_kc.shape[0]
    pad = K // 2
    N = x.shape[1]
    xp = jnp.pad(x, ((0, 0), (pad, pad), (0, 0)))
    out = sum(xp[:, t:t + N, :] * w_kc[t][None, None, :] for t in range(K)) + b
    out = 0.5 * out * (1.0 + lax.erf(out / math.sqrt(2.0)))
    if mask is not None:
        out = jnp.where(mask[..., None], out, 0.0)
    return out


if __name__ == "__main__":
    key = jax.random.PRNGKey(0)

    # ---- Test 1: small f32, mask with NaN-poisoned padding (exact masked_fill check) ----
    B, N, DIM, KSIZE = 2, 8, 32, 3
    k1, k2, k3, key = jax.random.split(key, 4)
    x = jax.random.normal(k1, (B, N, DIM), dtype=jnp.float32)
    weight = jax.random.normal(k2, (DIM, 1, KSIZE), dtype=jnp.float32) * 0.1
    bias = jax.random.normal(k3, (DIM,), dtype=jnp.float32) * 0.1
    lengths = jnp.array([N, 5])
    mask = jnp.arange(N)[None, :] < lengths[:, None]                  # (B, N) bool
    x_nan = jnp.where(mask[..., None], x, jnp.nan)                    # poison padding

    out = jax.block_until_ready(conv_position_embed(x_nan, weight, bias, mask))
    ref = _reference(x_nan, weight, bias, mask)
    assert out.shape == (B, N, DIM)
    assert bool(jnp.all(jnp.isfinite(out))), "NaN leaked through the mask"
    assert jnp.allclose(out, ref, atol=1e-5, rtol=1e-5), "mismatch (f32, masked)"

    # ---- Test 2: mask=None path ----
    out_nm = jax.block_until_ready(conv_position_embed(x, weight, bias, None))
    ref_nm = _reference(x, weight, bias, None)
    assert jnp.allclose(out_nm, ref_nm, atol=1e-5, rtol=1e-5), "mismatch (f32, no mask)"

    # ---- Test 3: channel-tiled grid (C=512 -> TC=256) + lane-replicated 128-wide mask ----
    B2, N2, DIM2, K2 = 2, 16, 512, 5
    k1, k2, k3, key = jax.random.split(key, 4)
    x2 = jax.random.normal(k1, (B2, N2, DIM2), dtype=jnp.float32)
    w2 = jax.random.normal(k2, (DIM2, 1, K2), dtype=jnp.float32) * 0.1
    b2 = jax.random.normal(k3, (DIM2,), dtype=jnp.float32) * 0.1
    mask2 = jnp.arange(N2)[None, :] < jnp.array([N2, 11])[:, None]
    out2 = jax.block_until_ready(
        conv_position_embed(x2, w2, b2, mask2, max_channel_tile=256))
    ref2 = _reference(x2, w2, b2, mask2)
    assert jnp.allclose(out2, ref2, atol=1e-5, rtol=1e-5), "mismatch (f32, tiled)"

    # tanh-approximate GELU option (EUP path), compared against the exact reference.
    out2a = jax.block_until_ready(
        conv_position_embed(x2, w2, b2, mask2, max_channel_tile=256,
                            approximate_gelu=True))
    assert jnp.allclose(out2a, ref2, atol=2e-2, rtol=2e-2), "mismatch (approx GELU)"

    # ---- Test 4: bf16 inputs (bf16 compute on v6e/v7x, f32 fallback on older chips) ----
    x2b = x2.astype(jnp.bfloat16)
    out2b = jax.block_until_ready(
        conv_position_embed(x2b, w2, b2, mask2, max_channel_tile=256))
    ref2b = _reference(x2b, w2, b2, mask2)
    assert out2b.dtype == jnp.bfloat16
    assert jnp.allclose(out2b.astype(jnp.float32), ref2b, atol=5e-2, rtol=5e-2), \
        "mismatch (bf16)"

    print("KERNEL_OK")
</pallas_src>

<mosaic_0001>
module attributes {stable_mosaic.version = 11 : i64} {
  func.func @_conv_pos_embed_kernel(%arg0: i32, %arg1: i32, %arg2: memref<1x8x32xf32, #tpu.memory_space<vmem>>, %arg3: memref<1x8x32xbf16, #tpu.memory_space<vmem>>, %arg4: memref<3x32xf32, #tpu.memory_space<vmem>>, %arg5: memref<1x32xf32, #tpu.memory_space<vmem>>, %arg6: memref<1x8x32xf32, #tpu.memory_space<vmem>>, %arg7: memref<17x32xf32, #tpu.memory_space<vmem>>) attributes {dimension_semantics = [#tpu.dimension_semantics<parallel>, #tpu.dimension_semantics<parallel>], iteration_bounds = array<i64: 2, 1>, scalar_prefetch = 0 : i64, scratch_operands = 1 : i64, tpu.core_type = #tpu.core_type<tc>, window_params = [{transform_indices = @transform_0, window_bounds = array<i64: 1, 8, 32>}, {transform_indices = @transform_1, window_bounds = array<i64: 1, 8, 32>}, {transform_indices = @transform_2, window_bounds = array<i64: 3, 32>}, {transform_indices = @transform_3, window_bounds = array<i64: 1, 32>}, {transform_indices = @transform_4, window_bounds = array<i64: 1, 8, 32>}]} {
    %c0 = arith.constant 0 : index
    %c0_0 = arith.constant 0 : index
    %c0_1 = arith.constant 0 : index
    %0 = vector.load %arg3[%c0, %c0_0, %c0_1] : memref<1x8x32xbf16, #tpu.memory_space<vmem>>, vector<1x8x32xbf16>
    %1 = vector.shape_cast %0 : vector<1x8x32xbf16> to vector<8x32xbf16>
    %cst = arith.constant 0.000000e+00 : bf16
    %2 = vector.broadcast %cst : bf16 to vector<8x32xbf16>
    %3 = arith.cmpf one, %1, %2 : vector<8x32xbf16>
    %c0_2 = arith.constant 0 : index
    %c0_3 = arith.constant 0 : index
    %c0_4 = arith.constant 0 : index
    %4 = vector.load %arg2[%c0_2, %c0_3, %c0_4] : memref<1x8x32xf32, #tpu.memory_space<vmem>>, vector<1x8x32xf32>
    %5 = vector.shape_cast %4 : vector<1x8x32xf32> to vector<8x32xf32>
    %cst_5 = arith.constant 0.000000e+00 : f32
    %6 = vector.broadcast %cst_5 : f32 to vector<8x32xf32>
    %7 = arith.select %3, %5, %6 : vector<8x32xi1>, vector<8x32xf32>
    %cst_6 = arith.constant 0.000000e+00 : f32
    %8 = vector.broadcast %cst_6 : f32 to vector<1x32xf32>
    %c7 = arith.constant 7 : index
    %c0_7 = arith.constant 0 : index
    %9 = vector.load %arg7[%c7, %c0_7] : memref<17x32xf32, #tpu.memory_space<vmem>>, vector<1x32xf32>
    tpu.vector_store %arg7[%c7, %c0_7], %8 {strides = array<i32>} : memref<17x32xf32, #tpu.memory_space<vmem>>, vector<1x32xf32>,
    %cst_8 = arith.constant 0.000000e+00 : f32
    %10 = vector.broadcast %cst_8 : f32 to vector<1x32xf32>
    %c16 = arith.constant 16 : index
    %c0_9 = arith.constant 0 : index
    %11 = vector.load %arg7[%c16, %c0_9] : memref<17x32xf32, #tpu.memory_space<vmem>>, vector<1x32xf32>
    tpu.vector_store %arg7[%c16, %c0_9], %10 {strides = array<i32>} : memref<17x32xf32, #tpu.memory_space<vmem>>, vector<1x32xf32>,
    %c8 = arith.constant 8 : index
    %c0_10 = arith.constant 0 : index
    %12 = vector.load %arg7[%c8, %c0_10] : memref<17x32xf32, #tpu.memory_space<vmem>>, vector<8x32xf32>
    tpu.vector_store %arg7[%c8, %c0_10], %7 {strides = array<i32>} : memref<17x32xf32, #tpu.memory_space<vmem>>, vector<8x32xf32>,
    %c7_11 = arith.constant 7 : index
    %c0_12 = arith.constant 0 : index
    %13 = vector.load %arg7[%c7_11, %c0_12] : memref<17x32xf32, #tpu.memory_space<vmem>>, vector<8x32xf32>
    %c0_13 = arith.constant 0 : index
    %c0_14 = arith.constant 0 : index
    %14 = vector.load %arg4[%c0_13, %c0_14] : memref<3x32xf32, #tpu.memory_space<vmem>>, vector<1x32xf32>
    %15 = vector.broadcast %14 : vector<1x32xf32> to vector<8x32xf32>
    %16 = arith.mulf %13, %15 : vector<8x32xf32>
    %c0_15 = arith.constant 0 : index
    %c0_16 = arith.constant 0 : index
    %17 = vector.load %arg5[%c0_15, %c0_16] : memref<1x32xf32, #tpu.memory_space<vmem>>, vector<1x32xf32>
    %18 = vector.broadcast %17 : vector<1x32xf32> to vector<8x32xf32>
    %19 = arith.addf %16, %18 : vector<8x32xf32>
    %c8_17 = arith.constant 8 : index
    %c0_18 = arith.constant 0 : index
    %20 = vector.load %arg7[%c8_17, %c0_18] : memref<17x32xf32, #tpu.memory_space<vmem>>, vector<8x32xf32>
    %c1 = arith.constant 1 : index
    %c0_19 = arith.constant 0 : index
    %21 = vector.load %arg4[%c1, %c0_19] : memref<3x32xf32, #tpu.memory_space<vmem>>, vector<1x32xf32>
    %22 = vector.broadcast %21 : vector<1x32xf32> to vector<8x32xf32>
    %23 = arith.mulf %20, %22 : vector<8x32xf32>
    %24 = arith.addf %19, %23 : vector<8x32xf32>
    %c9 = arith.constant 9 : index
    %c0_20 = arith.constant 0 : index
    %25 = vector.load %arg7[%c9, %c0_20] : memref<17x32xf32, #tpu.memory_space<vmem>>, vector<8x32xf32>
    %c2 = arith.constant 2 : index
    %c0_21 = arith.constant 0 : index
    %26 = vector.load %arg4[%c2, %c0_21] : memref<3x32xf32, #tpu.memory_space<vmem>>, vector<1x32xf32>
    %27 = vector.broadcast %26 : vector<1x32xf32> to vector<8x32xf32>
    %28 = arith.mulf %25, %27 : vector<8x32xf32>
    %29 = arith.addf %24, %28 : vector<8x32xf32>
    %cst_22 = arith.constant 5.000000e-01 : f32
    %30 = vector.broadcast %cst_22 : f32 to vector<8x32xf32>
    %31 = arith.mulf %30, %29 : vector<8x32xf32>
    %cst_23 = arith.constant 0.707106769 : f32
    %32 = vector.broadcast %cst_23 : f32 to vector<8x32xf32>
    %33 = arith.mulf %29, %32 : vector<8x32xf32>
    %34 = math.erf %33 : vector<8x32xf32>
    %cst_24 = arith.constant 1.000000e+00 : f32
    %35 = vector.broadcast %cst_24 : f32 to vector<8x32xf32>
    %36 = arith.addf %35, %34 : vector<8x32xf32>
    %37 = arith.mulf %31, %36 : vector<8x32xf32>
    %cst_25 = arith.constant 0.000000e+00 : f32
    %38 = vector.broadcast %cst_25 : f32 to vector<8x32xf32>
    %39 = arith.select %3, %37, %38 : vector<8x32xi1>, vector<8x32xf32>
    %c0_26 = arith.constant 0 : index
    %c0_27 = arith.constant 0 : index
    %c0_28 = arith.constant 0 : index
    %40 = vector.load %arg6[%c0_26, %c0_27, %c0_28] : memref<1x8x32xf32, #tpu.memory_space<vmem>>, vector<1x8x32xf32>
    %41 = vector.shape_cast %40 : vector<1x8x32xf32> to vector<8x32xf32>
    %42 = vector.shape_cast %39 : vector<8x32xf32> to vector<1x8x32xf32>
    tpu.vector_store %arg6[%c0_26, %c0_27, %c0_28], %42 {strides = array<i32>} : memref<1x8x32xf32, #tpu.memory_space<vmem>>, vector<1x8x32xf32>,
    return
  }
  func.func @transform_0(%arg0: i32, %arg1: i32) -> (i32, i32, i32) {
    %c0_i32 = arith.constant 0 : i32
    %c0_i32_0 = arith.constant 0 : i32
    return %arg0, %c0_i32, %arg1 : i32, i32, i32
  }
  func.func @transform_1(%arg0: i32, %arg1: i32) -> (i32, i32, i32) {
    %c0_i32 = arith.constant 0 : i32
    %c0_i32_0 = arith.constant 0 : i32
    %c0_i32_1 = arith.constant 0 : i32
    return %arg0, %c0_i32, %c0_i32_0 : i32, i32, i32
  }
  func.func @transform_2(%arg0: i32, %arg1: i32) -> (i32, i32) {
    %c0_i32 = arith.constant 0 : i32
    %c0_i32_0 = arith.constant 0 : i32
    return %c0_i32, %arg1 : i32, i32
  }
  func.func @transform_3(%arg0: i32, %arg1: i32) -> (i32, i32) {
    %c0_i32 = arith.constant 0 : i32
    %c0_i32_0 = arith.constant 0 : i32
    return %c0_i32, %arg1 : i32, i32
  }
  func.func @transform_4(%arg0: i32, %arg1: i32) -> (i32, i32, i32) {
    %c0_i32 = arith.constant 0 : i32
    %c0_i32_0 = arith.constant 0 : i32
    return %arg0, %c0_i32, %arg1 : i32, i32, i32
  }
}

</mosaic_0001>

<bundles_post_ra>
// kernel: tpu_custom_call.1
= control target key start
LH: loop header
LB: loop body
LE: loop exit
PB: predicated region body
PF: predicated region fallthrough
CT: control target
= control target key end

     0   :  { %9 = vsyncpa [#allocation4], 0  ;;  %s1008_s0 = inlined_call_operand.hbm [shape: f32[2,8,32], index: 0, kind: input, shape index: {}]   ;;  %s1009_s1 = inlined_call_operand.hbm [shape: bf16[2,8,32], index: 1, kind: input, shape index: {}]   ;;  %s1010_s2 = inlined_call_operand.vmem [shape: f32[3,32], index: 2, kind: input, shape index: {}]   ;;  %s1011_s3 = inlined_call_operand.vmem [shape: f32[1,32], index: 3, kind: input, shape index: {}]   ;;  %s1012_s4 = inlined_call_operand.hbm [shape: f32[2,8,32], index: 4, kind: output, shape index: {}]  }
   0x1   :  { %11 = vsyncpa [#allocation4 + $0x1], 0 }
   0x2   :  { %12 = vsyncpa [#allocation7], 0 }
   0x3   :  { %14 = vsyncpa [#allocation7 + $0x1], 0 }
   0x4   :  { %15 = vsyncpa [#allocation5], 0 }
   0x5   :  { %17 = vsyncpa [#allocation5 + $0x1], 0  ;;  %s767_s15 = smov 0   ;;  %s769_s16 = smov 0  }
   0x6   :  { %s771_s17 = smov 0   ;;  %s773_s18 = smov 0  }
   0x7   :  { %s775_s19 = smov 0   ;;  %s777_s20 = smov 0  }
   0x8 LB: > { %s496_s21 = sadd.s32 4294967295, %s735_s20   ;;  %s497_s22 = sadd.s32 4294967294, %s735_s20   ;;  %s735_s20 = sphi %s777_s20, %s23_s20   ;;  %s731_s19 = sphi %s775_s19, %s1034_s19   ;;  %s727_s18 = sphi %s773_s18, %s1033_s18   ;;  %s723_s17 = sphi %s771_s17, %s1032_s17   ;;  %s719_s16 = sphi %s769_s16, %s1031_s16   ;;  %s715_s15 = sphi %s767_s15, %s1030_s15  }
   0x9   : > { %s35_s23 = sadd.s32 1, %s731_s19  ;;  %s44_s24 = sadd.s32 1, %s723_s17 }
   0xa   : > { %p37_p0 = scmp.ge.s32.totalorder %s35_s23, 2  ;;  %p51_p1 = scmp.ne.s32.totalorder %s723_s17, %s719_s16 }
   0xb   : > { %p52_p2 = scmp.eq.s32.totalorder %s735_s20, 0  ;;  %p57_p3 = scmp.ne.s32.totalorder %s719_s16, %s715_s15 }
   0xc   : > { %s1036_s23 = smov (%p37_p0, %s35_s23), 0  ;;  %p58_p5 = scmp.eq.s32.totalorder %s496_s21, 0 }
   0xd   : > { %p808_p4 = por %p52_p2, %p51_p1  ;;  %s39_s26 = ssub.s32 %s731_s19, %s1036_s23 }
   0xe   : > { %p161_p6 = scmp.eq.s32.totalorder %s496_s21, 1  ;;  %p42_p7 = scmp.eq.s32.totalorder %s39_s26, 0 }
   0xf   : > { %p814_p8 = por %p58_p5, %p57_p3  ;;  %p167_p10 = scmp.eq.s32.totalorder %s497_s22, 1 }
  0x10   : > { %p818_p9 = por %p161_p6, %p51_p1  ;;  %p535_p13 = scmp.lt.s32.totalorder %s735_s20, 2 }
  0x11   : > { %s1016_s27 = scalar_select %p814_p8, 1, 0 }
  0x12   : > { %s1017_s28 = scalar_select %p818_p9, 1, 0 }
  0x13   : > { %s823_s29 = scalar_select %p42_p7, %s723_s17, %s44_s24  }
  0x14   : > { %p825_p11 = por %p167_p10, %p57_p3  ;;  %s832_s5 = sand.u32 1, %s723_s17  }
  0x15   : > { %s502_s6 = sshll.u32 %s832_s5, 3  ;;  %s503_s7 = sshll.u32 %s731_s19, 7 }
  0x16   : > { %s1018_s30 = scalar_select %p825_p11, 1, 0 }
  0x17   : > { %s839_s10 = scalar_lea.hbm %s1008_s0, %s503_s7  ;;  %s204_s11 = scalar_lea.vmem [#allocation3], %s502_s6 }
  0x18   : > { %s212_s12 = sshll.u32 %s204_s11, 4  ;;  %p845_p0 = pnand %p535_p13, %p808_p4  ;;  %s841_s12 = int_to_ptr.vmem [resolvable:$true] %s212_s12 }
  0x19   : > { %s201_s14 = scalar_lea.sflag [#allocation4], %s832_s5  ;;  %s589_s21 = scalar_lea.hbm %s839_s10, 128 }
  0x1a   : > { %p590_p3 = scmp.ne.s32.totalorder %s839_s10, %s589_s21  ;;  %p591_p5 = pneg %p845_p0 }
  0x1b   : > { %s594_s25 = scalar_lea.hbm %s1008_s0, 256  ;;  %p595_p4 = scmp.lt.u32.totalorder %s839_s10, %s1008_s0 }
  0x1c   : > { %p592_p6 = pnand %p591_p5, %p590_p3  ;;  %p596_p10 = scmp.lt.u32.totalorder %s594_s25, %s589_s21 }
  0x1d   : > { %p598_p12 = scmp.lt.u32.totalorder %s589_s21, %s839_s10 }
  0x1e   : > { %p593_p7 = pneg %p592_p6  ;;  %p597_p13 = por %p596_p10, %p595_p4 }
  0x20   : > { %p599_p1 = por %p598_p12, %p597_p13 }
  0x22   : > { %p600_p2 = pnand %p599_p1, %p593_p7 }
  0x24   : > { %603 = shalt.err (!%p600_p2)
}
  0x25   : > { %s604_s7 = scalar_lea.vmem %s841_s12, 128  ;;  %s737_s8 = smov [#allocation3]  }
  0x26   : > { %p605_p3 = scmp.ne.s32.totalorder %s841_s12, %s604_s7  ;;  %s609_s9 = sshll.u32 %s737_s8, 4  ;;  %s610_s9 = int_to_ptr.vmem [resolvable:$false] %s609_s9 }
  0x27   : > { %s611_s11 = scalar_lea.vmem %s610_s9, 256  ;;  %p612_p9 = scmp.lt.s32.totalorder %s841_s12, %s610_s9 }
  0x28   : > { %p607_p6 = pnand %p605_p3, %p591_p5  ;;  %p613_p4 = scmp.lt.s32.totalorder %s611_s11, %s604_s7 }
  0x2a   : > { %p608_p11 = pneg %p607_p6  ;;  %p614_p10 = por %p613_p4, %p612_p9 }
  0x2c   : > { %p615_p12 = pnand %p614_p10, %p608_p11 }
  0x2e   : > { %618 = shalt.err (!%p615_p12)
}
  0x2f   : > { %527 = dma.hbm_to_vmem [thread:$0]  (!%p845_p0), %s839_s10, 128, %s841_s12, %s201_s14  }
  0x30   : > { %p1020_p1 = scmp.lt.s32.totalorder %s735_s20, 3  ;;  %p1021_p2 = scmp.ge.s32.totalorder %s735_s20, 1 }
  0x31   : > { %s504_s22 = sshll.u32 %s832_s5, 2  ;;  %s505_s24 = sshll.u32 %s731_s19, 6 }
  0x32   : > { %p881_p7 = pnand %p1021_p2, %p1020_p1  ;;  %s890_s6 = scalar_lea.hbm %s1009_s1, %s505_s24 }
  0x33   : > { %s223_s7 = scalar_lea.vmem [#allocation6], %s504_s22  ;;  %s220_s10 = scalar_lea.sflag [#allocation7], %s832_s5 }
  0x34   : > { %s1022_s21 = scalar_select %p881_p7, 1, 0 }
  0x35   : > { %s230_s8 = sshll.u32 %s223_s7, 4  ;;  %s619_s12 = scalar_lea.hbm %s890_s6, 64  ;;  %s231_s8 = int_to_ptr.vmem [resolvable:$true] %s230_s8 }
  0x36   : > { %p620_p9 = scmp.ne.s32.totalorder %s890_s6, %s619_s12  ;;  %s624_s11 = scalar_lea.hbm %s1009_s1, 128 }
  0x37   : > { %p625_p3 = scmp.lt.u32.totalorder %s890_s6, %s1009_s1  ;;  %p626_p6 = scmp.lt.u32.totalorder %s624_s11, %s619_s12 }
  0x38   : > { %p622_p11 = pnand %p620_p9, %p591_p5  ;;  %p628_p10 = scmp.lt.u32.totalorder %s619_s12, %s890_s6 }
  0x39   : > { %p627_p4 = por %p626_p6, %p625_p3 }
  0x3a   : > { %p623_p13 = pneg %p622_p11 }
  0x3b   : > { %p629_p12 = por %p628_p10, %p627_p4 }
  0x3d   : > { %p630_p1 = pnand %p629_p12, %p623_p13 }
  0x3f   : > { %633 = shalt.err (!%p630_p1)
}
  0x40   : > { %s634_s5 = scalar_lea.vmem %s231_s8, 64  ;;  %s738_s22 = smov [#allocation6]  }
  0x41   : > { %p635_p2 = scmp.ne.s32.totalorder %s231_s8, %s634_s5  ;;  %s639_s26 = sshll.u32 %s738_s22, 4  ;;  %s640_s26 = int_to_ptr.vmem [resolvable:$false] %s639_s26 }
  0x42   : > { %s641_s7 = scalar_lea.vmem %s640_s26, 128  ;;  %p642_p8 = scmp.lt.s32.totalorder %s231_s8, %s640_s26 }
  0x43   : > { %p637_p9 = pnand %p635_p2, %p591_p5  ;;  %p643_p7 = scmp.lt.s32.totalorder %s641_s7, %s634_s5 }
  0x45   : > { %p638_p11 = pneg %p637_p9  ;;  %p644_p3 = por %p643_p7, %p642_p8 }
  0x47   : > { %p645_p6 = pnand %p644_p3, %p638_p11 }
  0x49   : > { %648 = shalt.err (!%p645_p6)
}
  0x4a   : > { %530 = dma.hbm_to_vmem [thread:$0]  (!%p845_p0), %s890_s6, 64, %s231_s8, %s220_s10  }
  0x4b   : > { %p1023_p13 = scmp.ne.s32.totalorder %s1022_s21, 0 }
  0x4c   : > { %s915_s12 = sand.u32 (!%p1023_p13), 1, %s719_s16   ;;  %p1024_p8 = scmp.ne.s32.totalorder (!%p1023_p13), %s1016_s27, 0 }
  0x4d   : > { %239 = sbr.rel (%p1023_p13) target bundleno = 143 (0x8f), region = 36  ;;  %s507_s14 = sshll.u32 (!%p1023_p13), %s915_s12, 3 }
  0x4e   : > { %s242_s9 = scalar_lea.sflag (!%p1023_p13), [#allocation4], %s915_s12  ;;  %s245_s11 = scalar_lea.vmem (!%p1023_p13), [#allocation3], %s507_s14 }
  0x54   : > { %702 = dma.done.wait (%p1024_p8), %s242_s9, 128  }
  0x55   : > { %704 = vsyncadd (%p1024_p8), %s242_s9, 4294967168  ;;  %s508_s13 = sshll.u32 %s915_s12, 2  ;;  %s251_s21 = scalar_lea.sflag [#allocation7], %s915_s12 }
  0x56   : > { %s254_s6 = scalar_lea.vmem [#allocation6], %s508_s13 }
  0x57   : > { %706 = dma.done.wait (%p1024_p8), %s251_s21, 64  }
  0x58   : > { %708 = vsyncadd (%p1024_p8), %s251_s21, 4294967232  ;;  %vm308_vm0 = vcmask 253952   ;;  %v739_v0 = vmov 0.0   ;;  %v301_v1 = vld [vmem:[%s254_s6] sm:$0xf]  ;;  %v740_v2 = vmov 0  }
  0x59   : > { %309 = vst.msk [vmem:[#allocation2 + $0x7] sm:$0x1] %vm308_vm0, %v739_v0  ;;  %310 = vst.msk [vmem:[#allocation2 + $0x10] sm:$0x1] %vm308_vm0, %v739_v0  ;;  %vm302_vm1 = vcmp.ne.bf16.partialorder %v301_v1, 0  ;;  %v303_v4 = vld [vmem:[%s245_s11] sm:$0xff] }
  0x5a   : > { %v304_v3 = vsel %vm302_vm1, 65537, %v740_v2  ;;  %vm311_vm2 = vcmask 261120   ;;  %v510_v8 = vld [vmem:[%s1010_s2] ss:$0 sm:$0xff]  ;;  %v512_v12 = vld [vmem:[%s1010_s2 + $0x1] ss:$0 sm:$0xff] }
  0x5b   : > { %v305_v5 = vunpack.c.l.b16 %v304_v3  ;;  %v511_v9 = vld [vmem:[%s1011_s3] ss:$0 sm:$0xff]  ;;  %v513_v15 = vld [vmem:[%s1010_s2 + $0x2] ss:$0 sm:$0xff]  ;;  %s290_s7 = scalar_lea.vmem [#allocation8], %s507_s14  ;;  %s515_s11 = sshll.u32 %s727_s18, 7 }
  0x5c   : > { %s366_s9 = sshll.u32 %s290_s7, 4  ;;  %s958_s6 = scalar_lea.hbm %s1012_s4, %s515_s11  ;;  %s953_s9 = int_to_ptr.vmem [resolvable:$true] %s366_s9 }
  0x5d   : > { %vm931_vm3 = vcmp.ne.s32.totalorder %v305_v5, 0  ;;  %s352_s27 = scalar_lea.sflag [#allocation5], %s915_s12  ;;  %s649_s14 = scalar_lea.vmem %s953_s9, 128 }
  0x5e   : > { %v307_v7 = vsel %vm931_vm3, %v303_v4, 0.0  ;;  %p650_p0 = scmp.ne.s32.totalorder %s953_s9, %s649_s14  ;;  %p1027_p5 = scmp.ne.s32.totalorder %s1017_s28, 0 }
  0x5f   : > { %312 = vst.msk [vmem:[#allocation2 + $0x8] sm:$0xff] %vm311_vm2, %v307_v7  ;;  %s741_s18 = smov [#allocation8]  }
  0x60   : > { %p651_p7 = pnand %p650_p0, %p1027_p5  ;;  %s653_s8 = sshll.u32 %s741_s18, 4  ;;  %s654_s8 = int_to_ptr.vmem [resolvable:$false] %s653_s8 }
  0x61   : > { %s655_s10 = scalar_lea.vmem %s654_s8, 256  ;;  %p656_p10 = scmp.lt.s32.totalorder %s953_s9, %s654_s8 }
  0x62   : > { %p652_p4 = pneg %p651_p7  ;;  %p657_p12 = scmp.lt.s32.totalorder %s655_s10, %s649_s14 }
  0x64   : > { %p658_p1 = por %p657_p12, %p656_p10 }
  0x66   : > { %v313_v10 = vld [vmem:[#allocation2 + $0x7] sm:$0xff]  ;;  %p659_p2 = pnand %p658_p1, %p652_p4 }
  0x67   : > { %v328_v11 = vld [vmem:[#allocation2 + $0x8] sm:$0xff]  ;;  %v319_v13 = vmul.f32 %v510_v8, %v313_v10 }
  0x68   : > { %v336_v14 = vld [vmem:[#allocation2 + $0x9] sm:$0xff]  ;;  %v334_v17 = vmul.f32 %v512_v12, %v328_v11 }
  0x69   : > { %v327_v16 = vadd.f32 %v511_v9, %v319_v13  ;;  %v342_v19 = vmul.f32 %v513_v15, %v336_v14 }
  0x6b   : > { %v335_v18 = vadd.f32 %v334_v17, %v327_v16 }
  0x6d   : > { %v343_v20 = vadd.f32 %v342_v19, %v335_v18 }
  0x6f   : > { %v345_v21 = vmul.f32 0.70710677, %v343_v20  ;;  %v344_v23 = vmul.f32 0.5, %v343_v20 }
  0x71   : > { %587 = verf.f32 %v345_v21 }
  0x7b   : > { %v588_v22 = vpop.eup %587 }
  0x7c   : > { %v347_v24 = vadd.f32 1.0, %v588_v22 }
  0x7e   : > { %v348_v25 = vmul.f32 %v347_v24, %v344_v23 }
  0x80   : > { %v349_v26 = vsel %vm931_vm3, %v348_v25, 0.0 }
  0x81   : > { %350 = vst.msk [vmem:[%s290_s7] sm:$0xff] %vm311_vm2, %v349_v26 }
  0x82   : > { %662 = shalt.err (!%p659_p2)
}
  0x83   : > { %s663_s12 = scalar_lea.hbm %s958_s6, 128  ;;  %s667_s5 = scalar_lea.hbm %s1012_s4, 256 }
  0x84   : > { %p664_p9 = scmp.ne.s32.totalorder %s958_s6, %s663_s12  ;;  %p668_p6 = scmp.lt.u32.totalorder %s958_s6, %s1012_s4 }
  0x85   : > { %p669_p13 = scmp.lt.u32.totalorder %s667_s5, %s663_s12  ;;  %p671_p0 = scmp.lt.u32.totalorder %s663_s12, %s958_s6 }
  0x86   : > { %p665_p11 = pnand %p664_p9, %p1027_p5 }
  0x87   : > { %p670_p8 = por %p669_p13, %p668_p6 }
  0x88   : > { %p666_p3 = pneg %p665_p11 }
  0x89   : > { %p672_p7 = por %p671_p0, %p670_p8 }
  0x8b   : > { %p673_p4 = pnand %p672_p7, %p666_p3 }
  0x8d   : > { %676 = shalt.err (!%p673_p4)
}
  0x8e   : > { %522 = dma.vmem_to_hbm [thread:$0]  (%p1027_p5), %s953_s9, 128, %s958_s6, %s352_s27  }
  0x8f PF: > { %s378_s7 = sand.u32 1, %s715_s15   ;;  %p1028_p10 = scmp.ne.s32.totalorder %s1018_s30, 0 }
  0x90   : > { %p1029_p12 = scmp.ge.s32.totalorder %s735_s20, 2  ;;  %s379_s11 = scalar_lea.sflag [#allocation5], %s378_s7 }
  0x92   : > { %p532_p1 = pnand %p1029_p12, %p1028_p10 }
  0x94   : > { %710 = dma.done.wait (!%p532_p1), %s379_s11, 128  }
  0x95   : > { %712 = vsyncadd (!%p532_p1), %s379_s11, 4294967168  ;;  %s23_s20 = sadd.s32 1, %s735_s20   ;;  %s1030_s15 = smov %s719_s16 }
  0x96   : > { %p20_p2 = scmp.ge.s32.totalorder %s23_s20, 4   ;;  %s1031_s16 = smov %s723_s17 }
  0x97   : > { %s1032_s17 = smov %s823_s29  ;;  %s1033_s18 = smov %s731_s19 }
  0x98   : > { %s1034_s19 = smov %s1036_s23  ;;  %22 = sbr.rel (!%p20_p2) target bundleno = 8 (0x8), region = 100 }
  0x9f   :  { %384 = vsyncpa [#allocation4], 1 }
  0xa0   :  { %386 = vsyncpa [#allocation4 + $0x1], 1 }
  0xa1   :  { %387 = vsyncpa [#allocation7], 1 }
  0xa2   :  { %389 = vsyncpa [#allocation7 + $0x1], 1 }
  0xa3   :  { %390 = vsyncpa [#allocation5], 1 }
  0xa4   :  { %392 = vsyncpa [#allocation5 + $0x1], 1 }

</bundles_post_ra>
